<compile_context>
chip_gen: v7x
topology: tpu7x:2x2x1
jax: 0.10.0
libtpu: 0.0.40
codegen_flags: <defaults>
</compile_context>

<pallas_src>
import numpy as np
import jax
import jax.numpy as jnp
from jax.experimental import pallas as pl
from jax.experimental.pallas import tpu as pltpu

C_IN = 17 * 2  # fixed by the module: Conv1d(17 * 2, c, k)


def _round_up(x, m):
    return ((x + m - 1) // m) * m


def _batch_tile(B):
    """Batch tile (rows per grid step)."""
    if B <= 8:
        return 8                      # sublane granularity, avoid masked rows
    if B <= 512:
        return _round_up(B, 8)        # single block (v5e/v6e: 1 TC, no split)
    return 512                        # >=2 parallel 512-row blocks (v7x: 2 TCs)


# --------------------------------------------------------------------------
# Pallas kernel: fused encoder matmul + bias + ReLU + decoder matmul + bias
# --------------------------------------------------------------------------
def _kernel(x_ref, a_ref, benc_ref, wd_ref, bd_ref, o_ref):
    # x_ref: (TB, Kp) bf16   a_ref: (Kp, CP) bf16   benc_ref: (1, CP) f32
    # wd_ref: (CP, 128) bf16 bd_ref: (1, 128) f32   o_ref: (TB, 128) f32
    enc = jnp.dot(x_ref[...], a_ref[...], preferred_element_type=jnp.float32)
    enc = jnp.maximum(enc + benc_ref[...], 0.0)            # pooled conv + ReLU
    o_ref[...] = (jnp.dot(enc.astype(wd_ref.dtype), wd_ref[...],
                          preferred_element_type=jnp.float32)
                  + bd_ref[...])                            # decoder (lane-dense)


# --------------------------------------------------------------------------
# One-time weight fusion (hoisted out of the per-call path)
# --------------------------------------------------------------------------
def prepare_params(params, T, kernel_sizes):
    """Fold conv weights + avg-pool + concat + decoder into fused matrices."""
    if T < max(kernel_sizes):
        raise ValueError("sequence length shorter than the largest conv kernel")
    C = C_IN
    sum_c = sum(int(w.shape[0]) for (w, _, _) in params["convs"])
    CP = _round_up(sum_c, 128)       # lane-dense encoder width
    K = T * C
    Kp = _round_up(K, 128)           # aligned contraction dim
    DP = 128                         # lane-dense decoder width (cols 0..1 real)

    # For branch (w, b) with kernel k:
    #   A[t, c, o] = (1/L) * sum_dk [t in window dk] * w[o, c, dk]
    # so  mean_L(conv1d(X)) + b == X_flat @ A + b   (bias constant over L).
    blocks, biases = [], []
    for (w, b, _), k in zip(params["convs"], kernel_sizes):
        L = T - k + 1
        t = np.arange(T)[:, None]
        dk = np.arange(k)[None, :]
        M = ((t >= dk) & (t < dk + L)).astype(np.float32) / float(L)   # (T, k)
        A_i = jnp.einsum("tk,ock->tco", jnp.asarray(M), w)             # (T, C, c_i)
        blocks.append(A_i.reshape(K, w.shape[0]))
        biases.append(b)
    A = jnp.concatenate(blocks, axis=-1)                                # (K, sum_c)
    A = jnp.pad(A, ((0, Kp - K), (0, CP - sum_c)))
    b_enc = jnp.pad(jnp.concatenate(biases), (0, CP - sum_c)).reshape(1, CP)
    Wd = jnp.pad(params["dec_w"].T, ((0, CP - sum_c), (0, DP - 2)))     # (CP, 128)
    bd = jnp.pad(params["dec_b"], (0, DP - 2)).reshape(1, DP)
    return {
        "A": A.astype(jnp.bfloat16),
        "b_enc": b_enc.astype(jnp.float32),
        "Wd": Wd.astype(jnp.bfloat16),
        "bd": bd.astype(jnp.float32),
    }


# --------------------------------------------------------------------------
# Jitted forward: pad + tile the batch, call the fused Pallas kernel
# --------------------------------------------------------------------------
@jax.jit
def pose_text_cnn_forward(X, fused):
    """X: (B, T, 34) float32 -> (B, 2) float32."""
    B, T, C = X.shape
    if C != C_IN:
        raise ValueError(f"expected {C_IN} input features, got {C}")
    A = fused["A"]
    Kp, CP = A.shape
    Wd = fused["Wd"]
    DP = Wd.shape[1]
    K = T * C
    if Kp < K:
        raise ValueError("fused params were built for a shorter sequence")

    Xf = X.reshape(B, K).astype(jnp.bfloat16)       # halve DMA payload
    if Kp != K:
        Xf = jnp.pad(Xf, ((0, 0), (0, Kp - K)))     # aligned K (zeros x zeros = 0)

    TB = _batch_tile(B)
    Bp = _round_up(B, TB)
    if Bp != B:
        Xf = jnp.pad(Xf, ((0, Bp - B), (0, 0)))     # padded rows sliced off below
    grid = (Bp // TB,)

    cost = pl.CostEstimate(
        flops=2 * Bp * Kp * CP + 2 * Bp * CP * DP,
        transcendentals=0,
        bytes_accessed=(Bp * Kp * 2 + Kp * CP * 2 + CP * 4
                        + CP * DP * 2 + DP * 4 + Bp * DP * 4),
    )

    out = pl.pallas_call(
        _kernel,
        out_shape=jax.ShapeDtypeStruct((Bp, DP), jnp.float32),
        grid=grid,
        in_specs=[
            pl.BlockSpec((TB, Kp), lambda i: (i, 0)),    # batch-tiled input
            pl.BlockSpec((Kp, CP), lambda i: (0, 0)),    # encoder weight (broadcast)
            pl.BlockSpec((1, CP), lambda i: (0, 0)),     # encoder bias
            pl.BlockSpec((CP, DP), lambda i: (0, 0)),    # decoder weight (lane-dense)
            pl.BlockSpec((1, DP), lambda i: (0, 0)),     # decoder bias
        ],
        out_specs=pl.BlockSpec((TB, DP), lambda i: (i, 0)),
        compiler_params=pltpu.CompilerParams(
            dimension_semantics=("parallel",)),
        cost_estimate=cost,
    )(Xf, A, fused["b_enc"], Wd, fused["bd"])
    return out[:B, :2]


# --------------------------------------------------------------------------
# Deterministic parameter init (PyTorch-style uniform bounds; synthetic)
# --------------------------------------------------------------------------
def init_params(key, kernel_sizes, num_channels):
    convs = []
    for k, c in zip(kernel_sizes, num_channels):
        key, k1, k2 = jax.random.split(key, 3)
        bound = 1.0 / np.sqrt(C_IN * k)
        w = jax.random.uniform(k1, (c, C_IN, k), jnp.float32, -bound, bound)
        b = jax.random.uniform(k2, (c,), jnp.float32, -bound, bound)
        convs.append((w, b, k))
    sum_c = sum(num_channels)
    key, k1, k2 = jax.random.split(key, 3)
    bound = 1.0 / np.sqrt(sum_c)
    dec_w = jax.random.uniform(k1, (2, sum_c), jnp.float32, -bound, bound)
    dec_b = jax.random.uniform(k2, (2,), jnp.float32, -bound, bound)
    return {"convs": convs, "dec_w": dec_w, "dec_b": dec_b}


# --------------------------------------------------------------------------
# Pure-JAX f32 reference (mirrors the PyTorch forward exactly, eval mode)
# --------------------------------------------------------------------------
def reference_forward(X, params):
    Xp = jnp.transpose(X, (0, 2, 1))                                  # (B, 34, T)
    encs = []
    for (w, b, _) in params["convs"]:
        out = jax.lax.conv_general_dilated(
            Xp, w, window_strides=(1,), padding="VALID",
            dimension_numbers=("NCH", "OIH", "NCH"))                  # (B, C_out, L)
        out = out + b[None, :, None]
        pooled = jnp.mean(out, axis=-1)                               # AdaptiveAvgPool1d(1)
        encs.append(jnp.maximum(pooled, 0.0))                         # ReLU
    enc = jnp.concatenate(encs, axis=-1)
    return enc @ params["dec_w"].T + params["dec_b"][None, :]         # decoder (eval dropout)


# --------------------------------------------------------------------------
if __name__ == "__main__":
    kernel_sizes = (3, 4, 5)
    num_channels = (32, 32, 32)
    B, T = 2, 16

    key = jax.random.PRNGKey(0)
    key, kx, kp = jax.random.split(key, 3)
    X = jax.random.normal(kx, (B, T, C_IN), jnp.float32)              # (2, 16, 34)
    params = init_params(kp, kernel_sizes, num_channels)

    fused = prepare_params(params, T, kernel_sizes)                   # one-time fold
    out = pose_text_cnn_forward(X, fused)
    out = jax.block_until_ready(out)

    ref = reference_forward(X, params)
    # bf16 input/weight cast (f32 accumulation) -> loosened tolerance.
    np.testing.assert_allclose(np.asarray(out), np.asarray(ref),
                               rtol=2e-2, atol=2e-2)

    print("KERNEL_OK")
</pallas_src>

<mosaic_0001>
module attributes {stable_mosaic.version = 11 : i64} {
  func.func @_kernel(%arg0: i32, %arg1: memref<8x640xbf16, #tpu.memory_space<vmem>>, %arg2: memref<640x128xbf16, #tpu.memory_space<vmem>>, %arg3: memref<1x128xf32, #tpu.memory_space<vmem>>, %arg4: memref<128x128xbf16, #tpu.memory_space<vmem>>, %arg5: memref<1x128xf32, #tpu.memory_space<vmem>>, %arg6: memref<8x128xf32, #tpu.memory_space<vmem>>) attributes {dimension_semantics = [#tpu.dimension_semantics<parallel>], iteration_bounds = array<i64: 1>, scalar_prefetch = 0 : i64, scratch_operands = 0 : i64, tpu.core_type = #tpu.core_type<tc>, window_params = [{transform_indices = @transform_0, window_bounds = array<i64: 8, 640>}, {pipeline_mode = #tpu.pipeline_mode<synchronous>, transform_indices = @transform_1, window_bounds = array<i64: 640, 128>}, {pipeline_mode = #tpu.pipeline_mode<synchronous>, transform_indices = @transform_2, window_bounds = array<i64: 1, 128>}, {pipeline_mode = #tpu.pipeline_mode<synchronous>, transform_indices = @transform_3, window_bounds = array<i64: 128, 128>}, {pipeline_mode = #tpu.pipeline_mode<synchronous>, transform_indices = @transform_4, window_bounds = array<i64: 1, 128>}, {transform_indices = @transform_5, window_bounds = array<i64: 8, 128>}]} {
    %c0 = arith.constant 0 : index
    %c0_0 = arith.constant 0 : index
    %0 = vector.load %arg1[%c0, %c0_0] : memref<8x640xbf16, #tpu.memory_space<vmem>>, vector<8x640xbf16>
    %c0_1 = arith.constant 0 : index
    %c0_2 = arith.constant 0 : index
    %1 = vector.load %arg2[%c0_1, %c0_2] : memref<640x128xbf16, #tpu.memory_space<vmem>>, vector<640x128xbf16>
    %cst = arith.constant dense<0.000000e+00> : vector<8x128xf32>
    %2 = tpu.matmul %0, %1, %cst {dimension_numbers = #tpu.dot_dimension_numbers<[1], [0], [0], [1], [0, 0, 1, 1], [], []>} : vector<8x640xbf16>, vector<640x128xbf16>, vector<8x128xf32> -> vector<8x128xf32>
    %c0_3 = arith.constant 0 : index
    %c0_4 = arith.constant 0 : index
    %3 = vector.load %arg3[%c0_3, %c0_4] : memref<1x128xf32, #tpu.memory_space<vmem>>, vector<1x128xf32>
    %4 = vector.broadcast %3 : vector<1x128xf32> to vector<8x128xf32>
    %5 = arith.addf %2, %4 : vector<8x128xf32>
    %cst_5 = arith.constant 0.000000e+00 : f32
    %6 = vector.broadcast %cst_5 : f32 to vector<8x128xf32>
    %7 = arith.maximumf %5, %6 : vector<8x128xf32>
    %8 = arith.truncf %7 : vector<8x128xf32> to vector<8x128xbf16>
    %c0_6 = arith.constant 0 : index
    %c0_7 = arith.constant 0 : index
    %9 = vector.load %arg4[%c0_6, %c0_7] : memref<128x128xbf16, #tpu.memory_space<vmem>>, vector<128x128xbf16>
    %cst_8 = arith.constant dense<0.000000e+00> : vector<8x128xf32>
    %10 = tpu.matmul %8, %9, %cst_8 {dimension_numbers = #tpu.dot_dimension_numbers<[1], [0], [0], [1], [0, 0, 1, 1], [], []>} : vector<8x128xbf16>, vector<128x128xbf16>, vector<8x128xf32> -> vector<8x128xf32>
    %c0_9 = arith.constant 0 : index
    %c0_10 = arith.constant 0 : index
    %11 = vector.load %arg5[%c0_9, %c0_10] : memref<1x128xf32, #tpu.memory_space<vmem>>, vector<1x128xf32>
    %12 = vector.broadcast %11 : vector<1x128xf32> to vector<8x128xf32>
    %13 = arith.addf %10, %12 : vector<8x128xf32>
    %c0_11 = arith.constant 0 : index
    %c0_12 = arith.constant 0 : index
    %14 = vector.load %arg6[%c0_11, %c0_12] : memref<8x128xf32, #tpu.memory_space<vmem>>, vector<8x128xf32>
    tpu.vector_store %arg6[%c0_11, %c0_12], %13 {strides = array<i32>} : memref<8x128xf32, #tpu.memory_space<vmem>>, vector<8x128xf32>,
    return
  }
  func.func @transform_0(%arg0: i32) -> (i32, i32) {
    %c0_i32 = arith.constant 0 : i32
    %c0_i32_0 = arith.constant 0 : i32
    return %arg0, %c0_i32 : i32, i32
  }
  func.func @transform_1(%arg0: i32) -> (i32, i32) {
    %c0_i32 = arith.constant 0 : i32
    %c0_i32_0 = arith.constant 0 : i32
    %c0_i32_1 = arith.constant 0 : i32
    return %c0_i32, %c0_i32_0 : i32, i32
  }
  func.func @transform_2(%arg0: i32) -> (i32, i32) {
    %c0_i32 = arith.constant 0 : i32
    %c0_i32_0 = arith.constant 0 : i32
    %c0_i32_1 = arith.constant 0 : i32
    return %c0_i32, %c0_i32_0 : i32, i32
  }
  func.func @transform_3(%arg0: i32) -> (i32, i32) {
    %c0_i32 = arith.constant 0 : i32
    %c0_i32_0 = arith.constant 0 : i32
    %c0_i32_1 = arith.constant 0 : i32
    return %c0_i32, %c0_i32_0 : i32, i32
  }
  func.func @transform_4(%arg0: i32) -> (i32, i32) {
    %c0_i32 = arith.constant 0 : i32
    %c0_i32_0 = arith.constant 0 : i32
    %c0_i32_1 = arith.constant 0 : i32
    return %c0_i32, %c0_i32_0 : i32, i32
  }
  func.func @transform_5(%arg0: i32) -> (i32, i32) {
    %c0_i32 = arith.constant 0 : i32
    %c0_i32_0 = arith.constant 0 : i32
    return %arg0, %c0_i32 : i32, i32
  }
}

</mosaic_0001>

<bundles_post_ra>
// kernel: pose_text_cnn_forward.1
= control target key start
LH: loop header
LB: loop body
LE: loop exit
PB: predicated region body
PF: predicated region fallthrough
CT: control target
= control target key end

     0   :  { %10 = vsyncpa [#allocation3], 0  ;;  %s861_s18 = smov [#allocation2]   ;;  %s950_s0 = inlined_call_operand.vmem [shape: bf16[8,640], index: 0, kind: input, shape index: {}]   ;;  %s951_s1 = inlined_call_operand.hbm [shape: bf16[640,128], index: 1, kind: input, shape index: {}]   ;;  %s952_s2 = inlined_call_operand.vmem [shape: f32[1,128], index: 2, kind: input, shape index: {}]   ;;  %s953_s3 = inlined_call_operand.vmem [shape: bf16[128,128], index: 3, kind: input, shape index: {}]   ;;  %s954_s4 = inlined_call_operand.vmem [shape: f32[1,128], index: 4, kind: input, shape index: {}]   ;;  %s955_s5 = inlined_call_operand.vmem [shape: f32[8,128], index: 5, kind: output, shape index: {}]  }
   0x1   :  { %s18_s19 = sshll.u32 %s861_s18, 4  ;;  %s837_s22 = scalar_lea.hbm %s951_s1, 5120  ;;  %s19_s19 = int_to_ptr.vmem [resolvable:$true] %s18_s19 }
   0x2   :  { %p838_p0 = scmp.ne.s32.totalorder %s951_s1, %s837_s22  ;;  %p841_p1 = scmp.lt.u32.totalorder %s837_s22, %s951_s1 }
   0x4   :  { %p843_p2 = pnand %p841_p1, %p838_p0 }
   0x6   :  { %846 = shalt.err (!%p843_p2)
}
   0x7   :  { %s847_s27 = scalar_lea.vmem %s19_s19, 5120  ;;  %p852_p4 = scmp.lt.s32.totalorder %s19_s19, %s19_s19 }
   0x8   :  { %p848_p3 = scmp.ne.s32.totalorder %s19_s19, %s847_s27  ;;  %p853_p5 = scmp.lt.s32.totalorder %s847_s27, %s847_s27 }
   0xa   :  { %p854_p6 = por %p853_p5, %p852_p4 }
   0xc   :  { %p855_p7 = pnand %p854_p6, %p848_p3 }
   0xe   :  { %858 = shalt.err (!%p855_p7)
}
   0xf   :  { %s862_s28 = smov 64   ;;  %s863_s29 = smov 4  }
  0x10   :  { %24 = dma.hbm_to_vmem [thread:$0]  %s951_s1, 5120, %s19_s19, [#allocation3], %s862_s28, %s862_s28, %s863_s29  }
  0x11   :  { %859 = dma.done.wait [#allocation3], 5120  }
  0x12   :  { %860 = vsyncadd [#allocation3], 4294962176  ;;  %v784_v0 = vld [vmem:[#allocation2 + $0x40] sm:$0xff]   ;;  %v788_v4 = vld [vmem:[#allocation2 + $0x48] sm:$0xff]   ;;  %v864_v35 = vmov 0.0   ;;  %vm865_vm0 = vmmov 0  }
  0x13   :  { %v785_v1 = vld [vmem:[#allocation2] sm:$0xff]   ;;  %677 = vmatprep.subr.bf16.mxu0 %v784_v0  ;;  %v789_v5 = vld [vmem:[#allocation2 + $0x8] sm:$0xff]   ;;  %v792_v8 = vld [vmem:[#allocation2 + $0x50] sm:$0xff]  }
  0x14   :  { %v786_v2 = vld [vmem:[#allocation2 + $0xc0] sm:$0xff]   ;;  %678 = vmatpush3.bf16.msra.mxu0 %v785_v1  ;;  %v790_v6 = vld [vmem:[#allocation2 + $0xc8] sm:$0xff]   ;;  %v793_v9 = vld [vmem:[#allocation2 + $0x10] sm:$0xff]  }
  0x15   :  { %v787_v3 = vld [vmem:[#allocation2 + $0x80] sm:$0xff]   ;;  %699 = vmatprep.subr.bf16.mxu1 %v786_v2  ;;  %679 = vmatprep.subr.bf16.mxu0 %v788_v4  ;;  %v791_v7 = vld [vmem:[#allocation2 + $0x88] sm:$0xff]   ;;  %v794_v10 = vld [vmem:[#allocation2 + $0xd0] sm:$0xff]  }
  0x16   :  { %700 = vmatpush3.bf16.msra.mxu1 %v787_v3  ;;  %v795_v11 = vld [vmem:[#allocation2 + $0x90] sm:$0xff]   ;;  %v796_v12 = vld [vmem:[#allocation2 + $0x58] sm:$0xff]   ;;  %v800_v16 = vld [vmem:[#allocation2 + $0x60] sm:$0xff]  }
  0x17   :  { %701 = vmatprep.subr.bf16.mxu1 %v790_v6  ;;  %v797_v13 = vld [vmem:[#allocation2 + $0x18] sm:$0xff]   ;;  %v801_v17 = vld [vmem:[#allocation2 + $0x20] sm:$0xff]   ;;  %v804_v20 = vld [vmem:[#allocation2 + $0x68] sm:$0xff]  }
  0x18   :  { %680 = vmatpush3.bf16.msra.mxu0 %v789_v5  ;;  %v798_v14 = vld [vmem:[#allocation2 + $0xd8] sm:$0xff]   ;;  %v802_v18 = vld [vmem:[#allocation2 + $0xe0] sm:$0xff]   ;;  %v805_v21 = vld [vmem:[#allocation2 + $0x28] sm:$0xff]  }
  0x19   :  { %681 = vmatprep.subr.bf16.mxu0 %v792_v8  ;;  %v799_v15 = vld [vmem:[#allocation2 + $0x98] sm:$0xff]   ;;  %v803_v19 = vld [vmem:[#allocation2 + $0xa0] sm:$0xff]   ;;  %v806_v22 = vld [vmem:[#allocation2 + $0xe8] sm:$0xff]  }
  0x1a   :  { %702 = vmatpush3.bf16.msra.mxu1 %v791_v7  ;;  %v807_v23 = vld [vmem:[#allocation2 + $0xa8] sm:$0xff]   ;;  %v808_v24 = vld [vmem:[#allocation2 + $0x70] sm:$0xff]   ;;  %v812_v28 = vld [vmem:[#allocation2 + $0x78] sm:$0xff]  }
  0x1b   :  { %703 = vmatprep.subr.bf16.mxu1 %v794_v10  ;;  %v809_v25 = vld [vmem:[#allocation2 + $0x30] sm:$0xff]   ;;  %v813_v29 = vld [vmem:[#allocation2 + $0x38] sm:$0xff]   ;;  %v35_v31 = vld [vmem:[%s950_s0] sm:$0xff] }
  0x1c   :  { %682 = vmatpush3.bf16.msra.mxu0 %v793_v9  ;;  %v810_v26 = vld [vmem:[#allocation2 + $0xf0] sm:$0xff]   ;;  %v814_v30 = vld [vmem:[#allocation2 + $0xf8] sm:$0xff]   ;;  %v623_v32 = vcombine.low %v35_v31, %v35_v31  ;;  %v624_v33 = vcombine.high %v35_v31, %v35_v31  ;;  %v36_v36 = vld [vmem:[%s950_s0 + $0x8] sm:$0xff] }
  0x1d   :  { %683 = vmatprep.subr.bf16.mxu0 %v796_v12  ;;  %v811_v27 = vld [vmem:[#allocation2 + $0xb0] sm:$0xff]   ;;  %v817_v34 = vld [vmem:[#allocation2 + $0xb8] sm:$0xff]   ;;  %v625_v37 = vcombine.low %v36_v36, %v36_v36  ;;  %v626_v38 = vcombine.high %v36_v36, %v36_v36  ;;  %v820_v39 = vld [vmem:[#allocation2 + $0x100] sm:$0xff]  }
  0x1e   :  { %704 = vmatpush3.bf16.msra.mxu1 %v795_v11  ;;  %415 = vmatprep.mubr.bf16.mxu0 %v624_v33  ;;  %v821_v40 = vld [vmem:[#allocation2 + $0x108] sm:$0xff]   ;;  %v822_v41 = vld [vmem:[#allocation2 + $0x110] sm:$0xff]   ;;  %v823_v42 = vld [vmem:[#allocation2 + $0x118] sm:$0xff]  }
  0x1f   :  { %705 = vmatprep.subr.bf16.mxu1 %v798_v14  ;;  %455 = vmatprep.mubr.bf16.mxu1 %v626_v38  ;;  %v824_v43 = vld [vmem:[#allocation2 + $0x120] sm:$0xff]   ;;  %v825_v44 = vld [vmem:[#allocation2 + $0x128] sm:$0xff]   ;;  %v826_v45 = vld [vmem:[#allocation2 + $0x130] sm:$0xff]  }
  0x20   :  { %684 = vmatpush3.bf16.msra.mxu0 %v797_v13  ;;  %v827_v46 = vld [vmem:[#allocation2 + $0x138] sm:$0xff]   ;;  %v828_v47 = vld [vmem:[%s950_s0 + $0x10] ss:$0 sps:$4 sm:$0xff]   ;;  %v829_v48 = vld [vmem:[%s953_s3] sm:$0xff]  }
  0x21   :  { %685 = vmatprep.subr.bf16.mxu0 %v800_v16  ;;  %v830_v49 = vld [vmem:[%s953_s3 + $0x8] sm:$0xff]   ;;  %v831_v50 = vld [vmem:[%s953_s3 + $0x10] sm:$0xff]   ;;  %v832_v51 = vld [vmem:[%s953_s3 + $0x18] sm:$0xff]  }
  0x22   :  { %706 = vmatpush3.bf16.msra.mxu1 %v799_v15  ;;  %v833_v52 = vld [vmem:[%s953_s3 + $0x20] sm:$0xff]   ;;  %v834_v53 = vld [vmem:[%s953_s3 + $0x28] sm:$0xff]   ;;  %v835_v54 = vld [vmem:[%s953_s3 + $0x30] sm:$0xff]  }
  0x23   :  { %707 = vmatprep.subr.bf16.mxu1 %v802_v18  ;;  %v836_v55 = vld [vmem:[%s953_s3 + $0x38] sm:$0xff]   ;;  %v622_v57 = vld [vmem:[%s952_s2] ss:$0 sm:$0xff] }
  0x24   :  { %686 = vmatpush3.bf16.msra.mxu0 %v801_v17  ;;  %v668_v12 = vld [vmem:[%s954_s4] ss:$0 sm:$0xff] }
  0x25   :  { %687 = vmatprep.subr.bf16.mxu0 %v804_v20 }
  0x26   :  { %708 = vmatpush3.bf16.msra.mxu1 %v803_v19 }
  0x27   :  { %709 = vmatprep.subr.bf16.mxu1 %v806_v22 }
  0x28   :  { %688 = vmatpush3.bf16.msra.mxu0 %v805_v21 }
  0x29   :  { %689 = vmatprep.subr.bf16.mxu0 %v808_v24 }
  0x2a   :  { %710 = vmatpush3.bf16.msra.mxu1 %v807_v23 }
  0x2b   :  { %711 = vmatprep.subr.bf16.mxu1 %v810_v26 }
  0x2c   :  { %690 = vmatpush3.bf16.msra.mxu0 %v809_v25 }
  0x2d   :  { %691 = vmatprep.subr.bf16.mxu0 %v812_v28 }
  0x2e   :  { %712 = vmatpush3.bf16.msra.mxu1 %v811_v27 }
  0x2f   :  { %713 = vmatprep.subr.bf16.mxu1 %v814_v30 }
  0x30   :  { %692 = vmatpush3.bf16.msra.mxu0 %v813_v29 }
  0x31   :  { %739 = vmatprep.subr.bf16.mxu0 %v864_v35 }
  0x32   :  { %714 = vmatpush3.bf16.msra.mxu1 %v817_v34 }
  0x33   :  { %416 = vmatmul.mubr.bf16.vlgmr.msra.gmra.mrb[0].mxu0 %v623_v32  ;;  %759 = vmatprep.subr.bf16.mxu1 %v864_v35 }
  0x34   :  { %740 = vmatpush3.bf16.msra.mxu0 %v820_v39  ;;  %755 = vmatprep.mubr.msk.bf16.mxu0 %vm865_vm0, %v864_v35 }
  0x35   :  { %456 = vmatmul.mubr.bf16.vlgmr.msra.gmra.mrb[0].mxu1 %v625_v37  ;;  %741 = vmatprep.subr.bf16.mxu0 %v864_v35 }
  0x36   :  { %775 = vmatprep.mubr.msk.bf16.mxu1 %vm865_vm0, %v864_v35  ;;  %760 = vmatpush3.bf16.msra.mxu1 %v829_v48 }
  0x37   :  { %761 = vmatprep.subr.bf16.mxu1 %v864_v35 }
  0x38   :  { %742 = vmatpush3.bf16.msra.mxu0 %v821_v40 }
  0x39   :  { %743 = vmatprep.subr.bf16.mxu0 %v864_v35 }
  0x3a   :  { %762 = vmatpush3.bf16.msra.mxu1 %v830_v49 }
  0x3b   :  { %763 = vmatprep.subr.bf16.mxu1 %v864_v35 }
  0x3c   :  { %744 = vmatpush3.bf16.msra.mxu0 %v822_v41 }
  0x3d   :  { %745 = vmatprep.subr.bf16.mxu0 %v864_v35 }
  0x3e   :  { %764 = vmatpush3.bf16.msra.mxu1 %v831_v50 }
  0x3f   :  { %765 = vmatprep.subr.bf16.mxu1 %v864_v35 }
  0x40   :  { %746 = vmatpush3.bf16.msra.mxu0 %v823_v42 }
  0x41   :  { %747 = vmatprep.subr.bf16.mxu0 %v864_v35 }
  0x42   :  { %766 = vmatpush3.bf16.msra.mxu1 %v832_v51 }
  0x43   :  { %767 = vmatprep.subr.bf16.mxu1 %v864_v35 }
  0x44   :  { %748 = vmatpush3.bf16.msra.mxu0 %v824_v43 }
  0x45   :  { %749 = vmatprep.subr.bf16.mxu0 %v864_v35 }
  0x46   :  { %768 = vmatpush3.bf16.msra.mxu1 %v833_v52 }
  0x47   :  { %769 = vmatprep.subr.bf16.mxu1 %v864_v35 }
  0x48   :  { %750 = vmatpush3.bf16.msra.mxu0 %v825_v44 }
  0x49   :  { %751 = vmatprep.subr.bf16.mxu0 %v864_v35 }
  0x4a   :  { %770 = vmatpush3.bf16.msra.mxu1 %v834_v53 }
  0x4b   :  { %771 = vmatprep.subr.bf16.mxu1 %v864_v35 }
  0x4c   :  { %752 = vmatpush3.bf16.msra.mxu0 %v826_v45 }
  0x4d   :  { %753 = vmatprep.subr.bf16.mxu0 %v864_v35 }
  0x4e   :  { %772 = vmatpush3.bf16.msra.mxu1 %v835_v54 }
  0x4f   :  { %773 = vmatprep.subr.bf16.mxu1 %v864_v35 }
  0x50   :  { %754 = vmatpush3.bf16.msra.mxu0 %v827_v46 }
  0x52   :  { %774 = vmatpush3.bf16.msra.mxu1 %v836_v55 }
  0x53   :  { %756 = vmatmul.mubr.bf16.vlgmr.msra.gmra.mrb[4].mxu0 %v828_v47 }
 0x106   :  { %v693_v56 = vpop.f32.mrb[0].mxu0 }
 0x107   :  { %v694_v58 = vpop.f32.mrb[1].mxu0 }
 0x108   :  { %v695_v59 = vadd.f32 %v694_v58, %v693_v56  ;;  %v696_v60 = vpop.f32.mrb[2].mxu0  ;;  %v715_v61 = vpop.f32.mrb[0].mxu1 }
 0x109   :  { %v697_v62 = vpop.f32.mrb[3].mxu0  ;;  %v716_v63 = vpop.f32.mrb[1].mxu1 }
 0x10a   :  { %v418_v0 = vadd.f32 %v695_v59, %v622_v57  ;;  %v717_v1 = vadd.f32 %v716_v63, %v715_v61  ;;  %v718_v2 = vpop.f32.mrb[2].mxu1 }
 0x10b   :  { %v719_v3 = vpop.f32.mrb[3].mxu1 }
 0x10c   :  { %v458_v4 = vadd.f32 %v717_v1, %v418_v0 }
 0x126   :  { %v497_v5 = vpop.f32.mrb[4].mxu0 }
 0x127   :  { %v498_v6 = vadd.f32 %v497_v5, %v458_v4  ;;  %v757_v7 = vpop.f32.mrb[5].mxu0 }
 0x128   :  { %v500_v8 = vpop.f32.mrb[6].mxu0 }
 0x129   :  { %v503_v9 = vmax.f32 %v498_v6, 0.0  ;;  %v758_v10 = vpop.f32.mrb[7].mxu0 }
 0x12b   :  { %v504_v11 = vpack.c.bf16 %v503_v9, %v503_v9 }
 0x12d   :  { %776 = vmatmul.mubr.bf16.vlgmr.msra.gmra.mrb[4].mxu1 %v504_v11 }
 0x200   :  { %v610_v13 = vpop.f32.mrb[4].mxu1 }
 0x201   :  { %v611_v14 = vadd.f32 %v668_v12, %v610_v13  ;;  %v777_v15 = vpop.f32.mrb[5].mxu1 }
 0x202   :  { %v613_v16 = vpop.f32.mrb[6].mxu1 }
 0x203   :  { %616 = vst [vmem:[%s955_s5] sm:$0xff] %v611_v14  ;;  %v778_v17 = vpop.f32.mrb[7].mxu1 }
 0x204   :  { %621 = vsyncpa [#allocation3], 1 }

</bundles_post_ra>
